<compile_context>
chip_gen: v7x
topology: tpu7x:2x2x1
jax: 0.10.0
libtpu: 0.0.40
codegen_flags: <defaults>
</compile_context>

<pallas_src>
import jax
import jax.numpy as jnp
from jax import lax
from jax.experimental import pallas as pl
from jax.experimental.pallas import tpu as pltpu

LANE = 128  # f32 lane width; batch tiles are lane-aligned in the gridded path.


def _layers_2_3(h1_t, w2_ref, b2_ref, w3_ref, b3_ref, o_ref):
    """Shared tail: (H, n) f32 activations -> (n, A) f32 Q-values stored to o_ref."""
    # Layer 2 on the MXU: bf16 operands, f32 accumulation.  N = n (batch tile) keeps
    # the MXU full on v6e/v7x and avoids f32-emulation passes (biggest win on v5e).
    h2_t = jnp.maximum(
        jnp.dot(w2_ref[...], h1_t.astype(jnp.bfloat16),
                preferred_element_type=jnp.float32) + b2_ref[...],
        0.0)                                                         # (H, n) f32
    # Layer 3: contract the hidden dim of both operands so the result lands directly
    # in (n, A) layout -> unpadded (batch, A) store, no post-kernel slice/transpose.
    # Kept in f32: its FLOPs are negligible (A = 2).
    q = lax.dot_general(h2_t, w3_ref[...], (((0,), (1,)), ((), ())),
                        preferred_element_type=jnp.float32)          # (n, A)
    o_ref[...] = q + b3_ref[...]                                     # + (1, A) row bias


def _dqn_kernel_tiled(xt_ref, w1_ref, b1_ref, w2_ref, b2_ref, w3_ref, b3_ref, o_ref):
    """Gridded tile: x^T (S, tb) -> Q (tb, A).  Weights stay VMEM-resident."""
    state_size = w1_ref.shape[1]
    # Layer 1 on the VPU: K = state_size (4) is tiny, an MXU pass would be >95% zero
    # padding.  Rank-1 updates: w1[:, k] lane-broadcast times a stride-0 sublane
    # broadcast of x row k.  Accumulator starts from bias + k=0 term.
    acc = b1_ref[...] + w1_ref[:, 0:1] * xt_ref[0:1, :]              # (H, tb)
    for k in range(1, state_size):                                   # static unroll
        acc = acc + w1_ref[:, k:k + 1] * xt_ref[k:k + 1, :]
    h1_t = jnp.maximum(acc, 0.0)
    _layers_2_3(h1_t, w2_ref, b2_ref, w3_ref, b3_ref, o_ref)


def _dqn_kernel_small(x_ref, w1_ref, b1_ref, w2_ref, b2_ref, w3_ref, b3_ref, o_ref):
    """Un-gridded tiny-batch kernel: x (b, S) -> Q (b, A) in one XLA op."""
    # Latency-bound path: layer 1 as one (padded) MXU pass keeps x in its natural
    # layout, so no host-side transpose / post-slice is needed.
    h1_t = jnp.maximum(
        lax.dot_general(w1_ref[...], x_ref[...], (((1,), (1,)), ((), ())),
                        preferred_element_type=jnp.float32) + b1_ref[...],
        0.0)                                                         # (H, b)
    _layers_2_3(h1_t, w2_ref, b2_ref, w3_ref, b3_ref, o_ref)


def _pick_tile_batch(batch, *, target_steps=4, max_tb=2048):
    """Lane-aligned batch tile giving >= target_steps grid steps when possible."""
    tb = ((pl.cdiv(batch, target_steps) + LANE - 1) // LANE) * LANE
    return int(max(LANE, min(tb, max_tb)))


def dqn_forward(x, params, *, small_batch_threshold=256, tile_batch=None):
    """x: (batch, state_size) f32 -> (batch, num_actions) f32 Q-values."""
    w1, b1 = params["w1"], params["b1"]          # (H, S) f32, (H, 1) f32
    w2, b2 = params["w2"], params["b2"]          # (H, H) bf16, (H, 1) f32
    w3, b3 = params["w3"], params["b3"]          # (A, H) f32, (1, A) f32
    batch, state_size = x.shape
    hidden = w1.shape[0]
    num_actions = w3.shape[0]

    if batch <= small_batch_threshold:
        # Online-inference path: everything whole-array in VMEM, single invocation,
        # output emitted in (batch, A) directly (no trailing slice op).
        vmem = pl.BlockSpec(memory_space=pltpu.MemorySpace.VMEM)
        return pl.pallas_call(
            _dqn_kernel_small,
            out_shape=jax.ShapeDtypeStruct((batch, num_actions), jnp.float32),
            in_specs=[vmem] * 7,
            out_specs=vmem,
        )(x, w1, b1, w2, b2, w3, b3)

    # Replay / training path: 1-D grid over the batch, weights resident across steps.
    tb = tile_batch if tile_batch is not None else _pick_tile_batch(batch)
    grid = (pl.cdiv(batch, tb),)        # ragged batch -> partial (masked) final block
    resident = lambda i: (0, 0)

    # Lane-dense x tiles + free sublane broadcasts of x rows in layer 1.
    x_t = x.T                           # (S, batch), tiny (16 B/row)

    return pl.pallas_call(
        _dqn_kernel_tiled,
        out_shape=jax.ShapeDtypeStruct((batch, num_actions), jnp.float32),
        grid=grid,
        in_specs=[
            pl.BlockSpec((state_size, tb), lambda i: (0, i)),   # x^T tile (pipelined)
            pl.BlockSpec((hidden, state_size), resident),        # w1
            pl.BlockSpec((hidden, 1), resident),                 # b1
            pl.BlockSpec((hidden, hidden), resident),            # w2 (bf16)
            pl.BlockSpec((hidden, 1), resident),                 # b2
            pl.BlockSpec((num_actions, hidden), resident),       # w3
            pl.BlockSpec((1, num_actions), resident),            # b3
        ],
        out_specs=pl.BlockSpec((tb, num_actions), lambda i: (i, 0)),
        compiler_params=pltpu.CompilerParams(
            dimension_semantics=("parallel",),   # megacore sharding on v7x
        ),
    )(x_t, w1, b1, w2, b2, w3, b3)


def init_params(key, state_size, num_actions, hidden=64):
    """PyTorch-nn.Linear-style U(-1/sqrt(fan_in), +) init in kernel-friendly layouts."""
    ks = jax.random.split(key, 6)

    def uni(k, shape, fan_in):
        bound = 1.0 / (fan_in ** 0.5)
        return jax.random.uniform(k, shape, jnp.float32, -bound, bound)

    return {
        "w1": uni(ks[0], (hidden, state_size), state_size),              # (out, in) f32
        "b1": uni(ks[1], (hidden, 1), state_size),                       # column f32
        "w2": uni(ks[2], (hidden, hidden), hidden).astype(jnp.bfloat16), # (out, in) bf16
        "b2": uni(ks[3], (hidden, 1), hidden),                           # column f32
        "w3": uni(ks[4], (num_actions, hidden), hidden),                 # (out, in) f32
        "b3": uni(ks[5], (1, num_actions), hidden),                      # row f32
    }


def dqn_reference(x, params):
    """Pure-JAX f32 reference matching the PyTorch forward (same stored weights)."""
    h1 = jnp.maximum(x @ params["w1"].T + params["b1"].T, 0.0)
    h2 = jnp.maximum(h1 @ params["w2"].astype(jnp.float32).T + params["b2"].T, 0.0)
    return h2 @ params["w3"].T + params["b3"]


if __name__ == "__main__":
    key = jax.random.PRNGKey(0)
    k_params, k_small, k_large = jax.random.split(key, 3)

    state_size = 4    # CartPole-v1 observation dim
    num_actions = 2   # CartPole-v1 action dim
    params = init_params(k_params, state_size, num_actions)

    # Path 1: tiny online-inference batch (single un-gridded pallas_call).
    x_small = jax.random.normal(k_small, (8, state_size), jnp.float32)
    q_small = jax.block_until_ready(dqn_forward(x_small, params))
    assert q_small.shape == (8, num_actions)
    assert jnp.allclose(q_small, dqn_reference(x_small, params), atol=2e-2, rtol=2e-2)

    # Path 2: replay-buffer-sized batch (gridded + pipelined; ragged batch exercises
    # the partial/masked final block, tb=256 -> 4 grid steps).
    x_large = jax.random.normal(k_large, (1000, state_size), jnp.float32)
    q_large = jax.block_until_ready(dqn_forward(x_large, params))
    assert q_large.shape == (1000, num_actions)
    assert jnp.allclose(q_large, dqn_reference(x_large, params), atol=2e-2, rtol=2e-2)

    print("KERNEL_OK")
</pallas_src>

<mosaic_0001>
module attributes {stable_mosaic.version = 11 : i64} {
  func.func @_dqn_kernel_small(%arg0: memref<8x4xf32, #tpu.memory_space<vmem>>, %arg1: memref<64x4xf32, #tpu.memory_space<vmem>>, %arg2: memref<64x1xf32, #tpu.memory_space<vmem>>, %arg3: memref<64x64xbf16, #tpu.memory_space<vmem>>, %arg4: memref<64x1xf32, #tpu.memory_space<vmem>>, %arg5: memref<2x64xf32, #tpu.memory_space<vmem>>, %arg6: memref<1x2xf32, #tpu.memory_space<vmem>>, %arg7: memref<8x2xf32, #tpu.memory_space<vmem>>) attributes {dimension_semantics = [], scalar_prefetch = 0 : i64, scratch_operands = 0 : i64, tpu.core_type = #tpu.core_type<tc>} {
    %c0 = arith.constant 0 : index
    %c0_0 = arith.constant 0 : index
    %0 = vector.load %arg1[%c0, %c0_0] : memref<64x4xf32, #tpu.memory_space<vmem>>, vector<64x4xf32>
    %c0_1 = arith.constant 0 : index
    %c0_2 = arith.constant 0 : index
    %1 = vector.load %arg0[%c0_1, %c0_2] : memref<8x4xf32, #tpu.memory_space<vmem>>, vector<8x4xf32>
    %cst = arith.constant dense<0.000000e+00> : vector<64x8xf32>
    %2 = tpu.matmul %0, %1, %cst {dimension_numbers = #tpu.dot_dimension_numbers<[1], [1], [0], [0], [0, 0, 1, 0], [], []>} : vector<64x4xf32>, vector<8x4xf32>, vector<64x8xf32> -> vector<64x8xf32>
    %c0_3 = arith.constant 0 : index
    %c0_4 = arith.constant 0 : index
    %3 = vector.load %arg2[%c0_3, %c0_4] : memref<64x1xf32, #tpu.memory_space<vmem>>, vector<64x1xf32>
    %4 = vector.broadcast %3 : vector<64x1xf32> to vector<64x8xf32>
    %5 = arith.addf %2, %4 : vector<64x8xf32>
    %cst_5 = arith.constant 0.000000e+00 : f32
    %6 = vector.broadcast %cst_5 : f32 to vector<64x8xf32>
    %7 = arith.maximumf %5, %6 : vector<64x8xf32>
    %c0_6 = arith.constant 0 : index
    %c0_7 = arith.constant 0 : index
    %8 = vector.load %arg3[%c0_6, %c0_7] : memref<64x64xbf16, #tpu.memory_space<vmem>>, vector<64x64xbf16>
    %9 = arith.truncf %7 : vector<64x8xf32> to vector<64x8xbf16>
    %cst_8 = arith.constant dense<0.000000e+00> : vector<64x8xf32>
    %10 = tpu.matmul %8, %9, %cst_8 {dimension_numbers = #tpu.dot_dimension_numbers<[1], [0], [0], [1], [0, 0, 1, 1], [], []>} : vector<64x64xbf16>, vector<64x8xbf16>, vector<64x8xf32> -> vector<64x8xf32>
    %c0_9 = arith.constant 0 : index
    %c0_10 = arith.constant 0 : index
    %11 = vector.load %arg4[%c0_9, %c0_10] : memref<64x1xf32, #tpu.memory_space<vmem>>, vector<64x1xf32>
    %12 = vector.broadcast %11 : vector<64x1xf32> to vector<64x8xf32>
    %13 = arith.addf %10, %12 : vector<64x8xf32>
    %cst_11 = arith.constant 0.000000e+00 : f32
    %14 = vector.broadcast %cst_11 : f32 to vector<64x8xf32>
    %15 = arith.maximumf %13, %14 : vector<64x8xf32>
    %c0_12 = arith.constant 0 : index
    %c0_13 = arith.constant 0 : index
    %16 = vector.load %arg5[%c0_12, %c0_13] : memref<2x64xf32, #tpu.memory_space<vmem>>, vector<2x64xf32>
    %cst_14 = arith.constant dense<0.000000e+00> : vector<8x2xf32>
    %17 = tpu.matmul %15, %16, %cst_14 {dimension_numbers = #tpu.dot_dimension_numbers<[0], [1], [1], [0], [0, 1, 1, 0], [], []>} : vector<64x8xf32>, vector<2x64xf32>, vector<8x2xf32> -> vector<8x2xf32>
    %c0_15 = arith.constant 0 : index
    %c0_16 = arith.constant 0 : index
    %18 = vector.load %arg6[%c0_15, %c0_16] : memref<1x2xf32, #tpu.memory_space<vmem>>, vector<1x2xf32>
    %19 = vector.broadcast %18 : vector<1x2xf32> to vector<8x2xf32>
    %20 = arith.addf %17, %19 : vector<8x2xf32>
    %c0_17 = arith.constant 0 : index
    %c0_18 = arith.constant 0 : index
    %21 = vector.load %arg7[%c0_17, %c0_18] : memref<8x2xf32, #tpu.memory_space<vmem>>, vector<8x2xf32>
    tpu.vector_store %arg7[%c0_17, %c0_18], %20 {strides = array<i32>} : memref<8x2xf32, #tpu.memory_space<vmem>>, vector<8x2xf32>,
    return
  }
}

</mosaic_0001>

<bundles_post_ra>
// kernel: tpu_custom_call.1
= control target key start
LH: loop header
LB: loop body
LE: loop exit
PB: predicated region body
PF: predicated region fallthrough
CT: control target
= control target key end

     0   :  { %vm84_vm0 = vcmask 31744   ;;  %v596_v2 = vmov 0   ;;  %vm305_vm1 = vcmask 523264   ;;  %vm598_vm2 = vmmov 0   ;;  %s751_s0 = inlined_call_operand.vmem [shape: f32[8,4], index: 0, kind: input, shape index: {}]   ;;  %s752_s1 = inlined_call_operand.vmem [shape: f32[64,4], index: 1, kind: input, shape index: {}]   ;;  %s753_s2 = inlined_call_operand.vmem [shape: f32[64,1], index: 2, kind: input, shape index: {}]   ;;  %s754_s4 = inlined_call_operand.vmem [shape: f32[64,1], index: 4, kind: input, shape index: {}]   ;;  %s755_s3 = inlined_call_operand.vmem [shape: bf16[64,64], index: 3, kind: input, shape index: {}]   ;;  %s756_s5 = inlined_call_operand.vmem [shape: f32[2,64], index: 5, kind: input, shape index: {}]   ;;  %s757_s6 = inlined_call_operand.vmem [shape: f32[1,2], index: 6, kind: input, shape index: {}]   ;;  %s758_s7 = inlined_call_operand.vmem [shape: f32[8,2], index: 7, kind: output, shape index: {}]  }
   0x1   :  { %v35_v0 = vld [vmem:[%s751_s0] sm:$0xff]  ;;  %590 = vset.pattern.permute.xlu0 %v596_v2  ;;  %591 = vset.pattern.permute.xlu1 %v596_v2  ;;  %v28_v3 = vld [vmem:[%s752_s1 + $0x8] sm:$0xff]  ;;  %v29_v4 = vld [vmem:[%s752_s1 + $0x10] sm:$0xff]  ;;  %v597_v2 = vmov 0.0   ;;  %vm507_vm3 = vcmask 15360  }
   0x2   :  { %v27_v1 = vld [vmem:[%s752_s1] sm:$0xff]  ;;  %552 = vmatprep.subr.msk.mxu0 %vm84_vm0, %v35_v0  ;;  %v38_v6 = vld [vmem:[%s753_s2 + $0x10] sm:$0xff]  ;;  %v37_v7 = vld [vmem:[%s753_s2 + $0x8] sm:$0xff] }
   0x3   :  { %554 = vmatprep.mubr.msk.f32.mxu0 %vm84_vm0, %v27_v1  ;;  %553 = vmatpush3.xpose.msk.msra.mxu0 %vm84_vm0, %v35_v0  ;;  %v36_v5 = vld [vmem:[%s753_s2] sm:$0xff]  ;;  %v39_v8 = vld [vmem:[%s753_s2 + $0x18] sm:$0xff]  ;;  %v41_v12 = vld [vmem:[%s753_s2 + $0x28] sm:$0xff] }
   0x4   :  { %46 = vperm.xlu0 %590, %v36_v5   ;;  %56 = vperm.xlu1 %591, %v38_v6   ;;  %v30_v9 = vld [vmem:[%s752_s1 + $0x18] sm:$0xff]  ;;  %v31_v10 = vld [vmem:[%s752_s1 + $0x20] sm:$0xff]  ;;  %v32_v13 = vld [vmem:[%s752_s1 + $0x28] sm:$0xff] }
   0x5   :  { %v40_v11 = vld [vmem:[%s753_s2 + $0x20] sm:$0xff]  ;;  %v33_v14 = vld [vmem:[%s752_s1 + $0x30] sm:$0xff]  ;;  %v43_v16 = vld [vmem:[%s753_s2 + $0x38] sm:$0xff]  ;;  %582 = vmatprep.subr.mxu0 %v597_v2 }
   0x6   :  { %555 = vmatmul.mubr.msk.f32.vlgmr.msra.gmra.mrb[0].mxu0 %vm84_vm0, %v28_v3  ;;  %v42_v15 = vld [vmem:[%s753_s2 + $0x30] sm:$0xff]  ;;  %v34_v17 = vld [vmem:[%s752_s1 + $0x38] sm:$0xff]  ;;  %v237_v18 = vld [vmem:[%s754_s4] sm:$0xff] }
   0x7   :  { %557 = vmatprep.mubr.msk.f32.mxu0 %vm84_vm0, %v29_v4  ;;  %v238_v19 = vld [vmem:[%s754_s4 + $0x8] sm:$0xff]  ;;  %v239_v20 = vld [vmem:[%s754_s4 + $0x10] sm:$0xff]  ;;  %v240_v21 = vld [vmem:[%s754_s4 + $0x18] sm:$0xff] }
   0x8   :  { %51 = vperm.xlu0 %590, %v37_v7   ;;  %61 = vperm.xlu1 %591, %v39_v8   ;;  %v241_v22 = vld [vmem:[%s754_s4 + $0x20] sm:$0xff]  ;;  %v242_v23 = vld [vmem:[%s754_s4 + $0x28] sm:$0xff]  ;;  %v243_v24 = vld [vmem:[%s754_s4 + $0x30] sm:$0xff] }
   0x9   :  { %v244_v25 = vld [vmem:[%s754_s4 + $0x38] sm:$0xff]  ;;  %v592_v26 = vld [vmem:[%s755_s3] sm:$0xff]   ;;  %v593_v63 = vld [vmem:[%s755_s3 + $0x8] sm:$0xff]  }
   0xa   :  { %558 = vmatmul.mubr.msk.f32.gmra.mrb[2].mxu0 %vm84_vm0, %v30_v9  ;;  %574 = vmatprep.mubr.msk.bf16.mxu1 %vm305_vm1, %v592_v26  ;;  %v594_v0 = vld [vmem:[%s755_s3 + $0x10] sm:$0xff]   ;;  %v595_v1 = vld [vmem:[%s755_s3 + $0x18] sm:$0xff]   ;;  %v391_v3 = vld [vmem:[%s756_s5] sm:$0x3] }
   0xb   :  { %560 = vmatprep.mubr.msk.f32.mxu0 %vm84_vm0, %v31_v10  ;;  %583 = vmatpush3.xpose.msk.msra.mxu0 %vm305_vm1, %v391_v3 }
   0xc   :  { %66 = vperm.xlu0 %590, %v40_v11   ;;  %71 = vperm.xlu1 %591, %v41_v12  }
   0xe   :  { %561 = vmatmul.mubr.msk.f32.gmra.mrb[4].mxu0 %vm84_vm0, %v32_v13 }
   0xf   :  { %563 = vmatprep.mubr.msk.f32.mxu0 %vm84_vm0, %v33_v14 }
  0x10   :  { %76 = vperm.xlu0 %590, %v42_v15   ;;  %81 = vperm.xlu1 %591, %v43_v16  }
  0x12   :  { %564 = vmatmul.mubr.msk.f32.gmra.mrb[6].mxu0 %vm84_vm0, %v34_v17 }
  0x13   :  { %584 = vmatprep.mubr.msk.f32.mxu0 %vm598_vm2, %v597_v2 }
  0x14   :  { %247 = vperm.xlu0 %590, %v237_v18   ;;  %252 = vperm.xlu1 %591, %v238_v19  }
  0x18   :  { %257 = vperm.xlu0 %590, %v239_v20   ;;  %262 = vperm.xlu1 %591, %v240_v21  }
  0x1c   :  { %267 = vperm.xlu0 %590, %v241_v22   ;;  %272 = vperm.xlu1 %591, %v242_v23  }
  0x20   :  { %277 = vperm.xlu0 %590, %v243_v24   ;;  %282 = vperm.xlu1 %591, %v244_v25  }
  0x83   :  { %v47_v27 = vpop.permute.xlu0 %46  ;;  %v57_v28 = vpop.permute.xlu1 %56 }
  0x87   :  { %v52_v29 = vpop.permute.xlu0 %51  ;;  %v62_v30 = vpop.permute.xlu1 %61 }
  0x8b   :  { %v72_v40 = vpop.permute.xlu1 %71  ;;  %v67_v43 = vpop.permute.xlu0 %66 }
  0x8f   :  { %v82_v52 = vpop.permute.xlu1 %81  ;;  %v77_v55 = vpop.permute.xlu0 %76 }
  0x93   :  { %v248_v5 = vpop.permute.xlu0 %247  ;;  %v253_v9 = vpop.permute.xlu1 %252 }
  0x97   :  { %v258_v13 = vpop.permute.xlu0 %257  ;;  %v263_v19 = vpop.permute.xlu1 %262 }
  0x9b   :  { %v268_v23 = vpop.permute.xlu0 %267  ;;  %v273_v26 = vpop.permute.xlu1 %272 }
  0xd9   :  { %v556_v31 = vpop.f32.mrb[0].mxu0 }
  0xda   :  { %v184_v32 = vadd.f32 %v556_v31, %v52_v29  ;;  %v178_v33 = vpop.f32.mrb[1].mxu0  ;;  %v278_v29 = vpop.permute.xlu0 %277 }
  0xdb   :  { %v179_v34 = vadd.f32 %v178_v33, %v47_v27 }
  0xdc   :  { %v218_v35 = vmax.f32 %v184_v32, 0.0  ;;  %v283_v32 = vpop.permute.xlu1 %282 }
  0xdd   :  { %v217_v36 = vmax.f32 %v179_v34, 0.0  ;;  %v559_v37 = vpop.f32.mrb[2].mxu0 }
  0xde   :  { %v194_v38 = vadd.f32 %v559_v37, %v62_v30  ;;  %v188_v39 = vpop.f32.mrb[3].mxu0  ;;  %v530_v37 = vld [vmem:[%s757_s6] ss:$0 sm:$0xff] }
  0xdf   :  { %v189_v41 = vadd.f32 %v188_v39, %v57_v28  ;;  %v233_v42 = vpack.c.bf16 %v218_v35, %v217_v36 }
  0xe0   :  { %v220_v44 = vmax.f32 %v194_v38, 0.0 }
  0xe1   :  { %v219_v45 = vmax.f32 %v189_v41, 0.0  ;;  %v562_v46 = vpop.f32.mrb[4].mxu0  ;;  %566 = vmatprep.subr.bf16.mxu1 %v233_v42 }
  0xe2   :  { %v204_v47 = vadd.f32 %v562_v46, %v72_v40  ;;  %v198_v48 = vpop.f32.mrb[5].mxu0  ;;  %567 = vmatpush3.bf16.msra.mxu1 %v233_v42 }
  0xe3   :  { %v234_v49 = vpack.c.bf16 %v220_v44, %v219_v45  ;;  %v199_v50 = vadd.f32 %v198_v48, %v67_v43 }
  0xe4   :  { %v222_v51 = vmax.f32 %v204_v47, 0.0 }
  0xe5   :  { %v221_v53 = vmax.f32 %v199_v50, 0.0  ;;  %v565_v54 = vpop.f32.mrb[6].mxu0  ;;  %568 = vmatprep.subr.bf16.mxu1 %v234_v49 }
  0xe6   :  { %v214_v56 = vadd.f32 %v565_v54, %v82_v52  ;;  %v208_v57 = vpop.f32.mrb[7].mxu0  ;;  %569 = vmatpush3.bf16.msra.mxu1 %v234_v49 }
  0xe7   :  { %v235_v58 = vpack.c.bf16 %v222_v51, %v221_v53  ;;  %v209_v59 = vadd.f32 %v208_v57, %v77_v55 }
  0xe8   :  { %v224_v60 = vmax.f32 %v214_v56, 0.0 }
  0xe9   :  { %v223_v61 = vmax.f32 %v209_v59, 0.0  ;;  %570 = vmatprep.subr.bf16.mxu1 %v235_v58 }
  0xea   :  { %571 = vmatpush3.bf16.msra.mxu1 %v235_v58 }
  0xeb   :  { %v236_v62 = vpack.c.bf16 %v224_v60, %v223_v61 }
  0xed   :  { %572 = vmatprep.subr.bf16.mxu1 %v236_v62 }
  0xee   :  { %573 = vmatpush3.bf16.msra.mxu1 %v236_v62 }
  0xf1   :  { %575 = vmatmul.mubr.msk.bf16.vlgmr.msra.gmra.mrb[0].mxu1 %vm305_vm1, %v593_v63 }
  0xf2   :  { %578 = vmatprep.mubr.msk.bf16.mxu1 %vm305_vm1, %v594_v0 }
  0xf9   :  { %579 = vmatmul.mubr.msk.bf16.gmra.mrb[4].mxu1 %vm305_vm1, %v595_v1 }
 0x1c4   :  { %v576_v4 = vpop.f32.mrb[0].mxu1 }
 0x1c5   :  { %v352_v6 = vpop.f32.mrb[1].mxu1  ;;  %v361_v14 = vadd.f32 %v576_v4, %v258_v13 }
 0x1c6   :  { %v353_v7 = vadd.f32 %v352_v6, %v248_v5  ;;  %v577_v8 = vpop.f32.mrb[2].mxu1 }
 0x1c7   :  { %v355_v10 = vpop.f32.mrb[3].mxu1  ;;  %v385_v21 = vmax.f32 %v361_v14, 0.0  ;;  %v364_v22 = vadd.f32 %v577_v8, %v263_v19 }
 0x1c8   :  { %v383_v11 = vmax.f32 %v353_v7, 0.0  ;;  %v356_v12 = vadd.f32 %v355_v10, %v253_v9 }
 0x1c9   :  { %v386_v24 = vmax.f32 %v364_v22, 0.0 }
 0x1ca   :  { %399 = vxpose.xlu0.b32.start [1/8] (short) (narrow) %v383_v11, 8  ;;  %v384_v15 = vmax.f32 %v356_v12, 0.0 }
 0x1cc   :  { %v580_v16 = vpop.f32.mrb[4].mxu1 }
 0x1cd   :  { %v368_v17 = vpop.f32.mrb[5].mxu1  ;;  %v377_v30 = vadd.f32 %v580_v16, %v278_v29 }
 0x1ce   :  { %v581_v18 = vpop.f32.mrb[6].mxu1  ;;  %400 = vxpose.xlu0.b32.cont [2/8] (short) (narrow) %v384_v15, 8  ;;  %v369_v25 = vadd.f32 %v368_v17, %v268_v23 }
 0x1cf   :  { %v371_v20 = vpop.f32.mrb[7].mxu1  ;;  %v389_v33 = vmax.f32 %v377_v30, 0.0  ;;  %v380_v34 = vadd.f32 %v581_v18, %v283_v32 }
 0x1d0   :  { %v387_v27 = vmax.f32 %v369_v25, 0.0  ;;  %v372_v28 = vadd.f32 %v371_v20, %v273_v26 }
 0x1d1   :  { %v390_v35 = vmax.f32 %v380_v34, 0.0 }
 0x1d2   :  { %401 = vxpose.xlu0.b32.cont [3/8] (short) (narrow) %v385_v21, 8  ;;  %v388_v31 = vmax.f32 %v372_v28, 0.0 }
 0x1d6   :  { %402 = vxpose.xlu0.b32.cont [4/8] (short) (narrow) %v386_v24, 8 }
 0x1da   :  { %403 = vxpose.xlu0.b32.cont [5/8] (short) (narrow) %v387_v27, 8 }
 0x1de   :  { %404 = vxpose.xlu0.b32.cont [6/8] (short) (narrow) %v388_v31, 8 }
 0x1e2   :  { %405 = vxpose.xlu0.b32.cont [7/8] (short) (narrow) %v389_v33, 8 }
 0x1e6   :  { %406 = vxpose.xlu0.b32.end [8/8] (short) (narrow) %v390_v35, 8 }
 0x24a   :  { %v415_v36 = vpop.trf.xlu0 }
 0x24b   :  { %585 = vmatmul.mubr.msk.f32.vlgmr.msra.gmra.mrb[8].mxu0 %vm305_vm1, %v415_v36 }
 0x31e   :  { %v503_v38 = vpop.f32.mrb[8].mxu0 }
 0x31f   :  { %v504_v39 = vadd.f32 %v530_v37, %v503_v38  ;;  %v586_v40 = vpop.f32.mrb[9].mxu0 }
 0x321   :  { %508 = vst.msk [vmem:[%s758_s7] sm:$0xff] %vm507_vm3, %v504_v39 }

</bundles_post_ra>
